<compile_context>
chip_gen: v7x
topology: tpu7x:2x2x1
jax: 0.10.0
libtpu: 0.0.40
codegen_flags: <defaults>
</compile_context>

<pallas_src>
import math

import jax
import jax.numpy as jnp
from jax import lax
from jax.experimental import pallas as pl
from jax.experimental.pallas import tpu as pltpu


def _make_kernel(compute_dtype, exact_softmax):
    cdt = compute_dtype

    def kernel(q_ref, k_ref, vwo_ref, bo_ref, out_ref, attn_ref):
        h = pl.program_id(2)

        q = q_ref[0, 0]                        # (TQ, E) cdt, scale pre-folded
        k = k_ref[0, 0]                        # (N,  E) cdt
        # scores = Q K^T via a last-dim contraction (no in-kernel transpose)
        scores = lax.dot_general(q, k, (((1,), (1,)), ((), ())),
                                 preferred_element_type=jnp.float32)  # (TQ,N)

        m = jnp.max(scores, axis=-1, keepdims=True)
        e = jnp.exp(scores - m)
        denom = jnp.sum(e, axis=-1, keepdims=True)
        if exact_softmax:
            inv = 1.0 / denom                       # exact: rows sum to 1
        else:
            inv = pl.reciprocal(denom, approx=True)  # EUP, free slot
        a = e * inv                                  # (TQ, N) f32

        attn_ref[0, 0] = a.astype(attn_ref.dtype)

        # Fused AV + output projection: contraction dim N, lane-dense d_model.
        contrib = jnp.dot(a.astype(cdt), vwo_ref[0, 0],
                          preferred_element_type=jnp.float32)  # (TQ, d_model)

        @pl.when(h == 0)
        def _():
            out_ref[0] = (contrib + bo_ref[...]).astype(out_ref.dtype)

        @pl.when(h != 0)
        def _():
            out_ref[0] = out_ref[0] + contrib.astype(out_ref.dtype)

    return kernel


def _vmem_capacity_bytes():
    """Generation-aware VMEM capacity; conservative 64 MiB fallback (v7x)."""
    try:
        info = pltpu.get_tpu_info()
        cap = getattr(info, "vmem_capacity_bytes", None)
        if cap:
            return int(cap)
    except Exception:
        pass
    return 64 * 1024 * 1024


def _pick_query_tile(N, d_model, e_k, bytes_c, vmem_cap):
    """Largest query tile (preferring multiples of 128) whose resident
    blocks + softmax temporaries fit about half of VMEM."""
    if N % 8 != 0 or N <= 128:
        return N
    # Per-query-row VMEM: attn out block (f32, x2 buffers) + ~3 (TQ,N) f32
    # softmax temporaries + q tile (x2) + out tile (f32, x2).
    per_row = (2 + 3) * N * 4 + 2 * e_k * bytes_c + 2 * d_model * 4
    fixed = 2 * N * (e_k + d_model) * bytes_c          # K and V@Wo blocks
    budget = max(0, vmem_cap // 2 - fixed)
    cap_tq = max(8, min(N, (budget // per_row) // 8 * 8))
    t = (cap_tq // 128) * 128                          # prefer MXU-sized M
    while t >= 128:
        if N % t == 0:
            return t
        t -= 128
    t = cap_tq
    while t >= 8:
        if N % t == 0:
            return t
        t -= 8
    return 8


def attention_layer_ds_integ(queries, keys, values, params, n_heads,
                             compute_dtype=jnp.bfloat16):
    """Pallas forward of AttentionLayer_DS_integ.

    queries/keys/values: (B, N, d_model) float32
    params: PyTorch-Linear-convention weights (W is (out, in)) + biases.
    compute_dtype: dtype of MXU operands (bf16 default); softmax/accum are f32.
    Returns (out (B, N, d_model) f32, attn (B, H, N, N) f32).
    """
    B, N, d_model = queries.shape
    H = n_heads
    HE = params["wq"].shape[0]          # d_keys * n_heads
    HD = params["wv"].shape[0]          # d_values * n_heads
    assert HE % H == 0 and HD % H == 0
    E = HE // H                          # d_keys
    Ev = HD // H                         # d_values
    scale = 1.0 / math.sqrt(E)

    cdt = compute_dtype
    bytes_c = jnp.dtype(cdt).itemsize

    vmem_cap = _vmem_capacity_bytes()
    TQ = _pick_query_tile(N, d_model, E, bytes_c, vmem_cap)
    assert N % TQ == 0
    n_q_tiles = N // TQ

    # ---- projections hoisted to XLA (full MXU efficiency, no qi==0 bubble) ----
    q = (queries @ params["wq"].T + params["bq"]) * scale   # fold softmax scale
    k = keys @ params["wk"].T + params["bk"]
    v = values @ params["wv"].T + params["bv"]
    q = q.reshape(B, N, H, E).transpose(0, 2, 1, 3).astype(cdt)   # (B,H,N,E)
    k = k.reshape(B, N, H, E).transpose(0, 2, 1, 3).astype(cdt)   # (B,H,N,E)
    v = v.reshape(B, N, H, Ev).transpose(0, 2, 1, 3)              # (B,H,N,Ev) f32
    # Pre-fold the output projection into V: VWo_h = V_h @ Wo_h^T
    wo_h = params["wo"].T.reshape(H, Ev, d_model)                 # (H,Ev,d_model)
    vwo = jnp.einsum("bhne,hed->bhnd", v, wo_h).astype(cdt)       # (B,H,N,d_model)
    bo = params["bo"].reshape(1, -1).astype(jnp.float32)          # (1, d_model)

    # ---- VMEM budget / limit (generation-aware) ----
    est = (2 * TQ * E * bytes_c          # q tile
           + 2 * N * E * bytes_c         # k slab
           + 2 * N * d_model * bytes_c   # v@wo slab
           + 2 * TQ * d_model * 4        # out tile
           + 2 * TQ * N * 4              # attn tile
           + 4 * TQ * N * 4              # softmax temporaries
           + 2 * d_model * 4)            # bias
    vmem_limit = int(min(0.75 * vmem_cap, max(2 * est, 32 * 1024 * 1024)))

    cost = pl.CostEstimate(
        flops=int(2 * B * H * N * N * (E + d_model)),
        transcendentals=int(B * H * N * N),
        bytes_accessed=int((q.size + k.size + vwo.size) * bytes_c
                           + B * N * d_model * 4       # out write
                           + B * H * N * N * 4),       # attn write
    )

    grid_spec = pltpu.PrefetchScalarGridSpec(
        num_scalar_prefetch=0,
        grid=(B, n_q_tiles, H),
        in_specs=[
            pl.BlockSpec((1, 1, TQ, E), lambda b, qi, h: (b, h, qi, 0)),       # q
            pl.BlockSpec((1, 1, N, E), lambda b, qi, h: (b, h, 0, 0)),         # k
            pl.BlockSpec((1, 1, N, d_model), lambda b, qi, h: (b, h, 0, 0)),   # v@wo
            pl.BlockSpec((1, d_model), lambda b, qi, h: (0, 0)),               # bo
        ],
        out_specs=[
            pl.BlockSpec((1, TQ, d_model), lambda b, qi, h: (b, qi, 0)),       # out (head-accum)
            pl.BlockSpec((1, 1, TQ, N), lambda b, qi, h: (b, h, qi, 0)),       # attn
        ],
    )

    out, attn = pl.pallas_call(
        _make_kernel(cdt, exact_softmax=(cdt == jnp.float32)),
        grid_spec=grid_spec,
        out_shape=(
            jax.ShapeDtypeStruct((B, N, d_model), jnp.float32),
            jax.ShapeDtypeStruct((B, H, N, N), jnp.float32),
        ),
        compiler_params=pltpu.CompilerParams(
            dimension_semantics=("parallel", "parallel", "arbitrary"),
            vmem_limit_bytes=vmem_limit),
        cost_estimate=cost,
    )(q, k, vwo, bo)
    return out, attn


def _reference(queries, keys, values, params, n_heads):
    """Pure-JAX reference reproducing the PyTorch module exactly."""
    B, N, d_model = queries.shape
    H = n_heads
    q = queries @ params["wq"].T + params["bq"]
    k = keys @ params["wk"].T + params["bk"]
    v = values @ params["wv"].T + params["bv"]
    E = q.shape[-1] // H
    q = q.reshape(B, N, H, E)
    k = k.reshape(B, N, H, E)
    v = v.reshape(B, N, H, -1)
    scale = 1.0 / math.sqrt(E)
    scores = jnp.einsum("blhe,bshe->bhls", q, k)
    a = jax.nn.softmax(scale * scores, axis=-1)
    o = jnp.einsum("bhls,bshd->blhd", a, v).reshape(B, N, -1)
    out = o @ params["wo"].T + params["bo"]
    return out, a


if __name__ == "__main__":
    # Small shapes consistent with the module.
    B, N, d_model, H = 2, 8, 32, 4
    d_keys = d_model // H
    HE = d_keys * H

    key = jax.random.PRNGKey(0)
    ks = jax.random.split(key, 12)
    s = 1.0 / math.sqrt(d_model)
    params = {
        "wq": jax.random.uniform(ks[0], (HE, d_model), jnp.float32, -s, s),
        "bq": jax.random.uniform(ks[1], (HE,), jnp.float32, -s, s),
        "wk": jax.random.uniform(ks[2], (HE, d_model), jnp.float32, -s, s),
        "bk": jax.random.uniform(ks[3], (HE,), jnp.float32, -s, s),
        "wv": jax.random.uniform(ks[4], (HE, d_model), jnp.float32, -s, s),
        "bv": jax.random.uniform(ks[5], (HE,), jnp.float32, -s, s),
        "wo": jax.random.uniform(ks[6], (d_model, HE), jnp.float32, -s, s),
        "bo": jax.random.uniform(ks[7], (d_model,), jnp.float32, -s, s),
    }

    queries = jax.random.normal(ks[8], (B, N, d_model), jnp.float32)
    keys_in = jax.random.normal(ks[9], (B, N, d_model), jnp.float32)
    values_in = jax.random.normal(ks[10], (B, N, d_model), jnp.float32)

    ref_out, ref_attn = _reference(queries, keys_in, values_in, params, H)

    # f32 MXU path (exact softmax divide)
    out, attn = attention_layer_ds_integ(queries, keys_in, values_in, params, H,
                                         compute_dtype=jnp.float32)
    jax.block_until_ready((out, attn))
    assert jnp.allclose(out, ref_out, atol=2e-2, rtol=2e-2), "f32 out mismatch"
    assert jnp.allclose(attn, ref_attn, atol=2e-2, rtol=2e-2), "f32 attn mismatch"

    # bf16 MXU path (default; softmax / accumulation stay f32)
    out_bf, attn_bf = attention_layer_ds_integ(queries, keys_in, values_in,
                                               params, H)
    jax.block_until_ready((out_bf, attn_bf))
    assert jnp.allclose(out_bf, ref_out, atol=8e-2, rtol=8e-2), "bf16 out mismatch"
    assert jnp.allclose(attn_bf, ref_attn, atol=8e-2, rtol=8e-2), "bf16 attn mismatch"

    print("KERNEL_OK")
</pallas_src>

<mosaic_0001>
module attributes {stable_mosaic.version = 11 : i64} {
  func.func @kernel(%arg0: i32, %arg1: i32, %arg2: i32, %arg3: memref<1x1x8x8xf32, #tpu.memory_space<vmem>>, %arg4: memref<1x1x8x8xf32, #tpu.memory_space<vmem>>, %arg5: memref<1x1x8x32xf32, #tpu.memory_space<vmem>>, %arg6: memref<1x32xf32, #tpu.memory_space<vmem>>, %arg7: memref<1x8x32xf32, #tpu.memory_space<vmem>>, %arg8: memref<1x1x8x8xf32, #tpu.memory_space<vmem>>) attributes {dimension_semantics = [#tpu.dimension_semantics<parallel>, #tpu.dimension_semantics<parallel>, #tpu.dimension_semantics<arbitrary>], iteration_bounds = array<i64: 2, 1, 4>, scalar_prefetch = 0 : i64, scratch_operands = 0 : i64, tpu.core_type = #tpu.core_type<tc>, window_params = [{transform_indices = @transform_0, window_bounds = array<i64: 1, 1, 8, 8>}, {transform_indices = @transform_1, window_bounds = array<i64: 1, 1, 8, 8>}, {transform_indices = @transform_2, window_bounds = array<i64: 1, 1, 8, 32>}, {pipeline_mode = #tpu.pipeline_mode<synchronous>, transform_indices = @transform_3, window_bounds = array<i64: 1, 32>}, {transform_indices = @transform_4, window_bounds = array<i64: 1, 8, 32>}, {transform_indices = @transform_5, window_bounds = array<i64: 1, 1, 8, 8>}]} {
    %c0 = arith.constant 0 : index
    %c0_0 = arith.constant 0 : index
    %c0_1 = arith.constant 0 : index
    %c0_2 = arith.constant 0 : index
    %0 = vector.load %arg3[%c0, %c0_0, %c0_1, %c0_2] : memref<1x1x8x8xf32, #tpu.memory_space<vmem>>, vector<1x1x8x8xf32>
    %1 = vector.shape_cast %0 : vector<1x1x8x8xf32> to vector<8x8xf32>
    %c0_3 = arith.constant 0 : index
    %c0_4 = arith.constant 0 : index
    %c0_5 = arith.constant 0 : index
    %c0_6 = arith.constant 0 : index
    %2 = vector.load %arg4[%c0_3, %c0_4, %c0_5, %c0_6] : memref<1x1x8x8xf32, #tpu.memory_space<vmem>>, vector<1x1x8x8xf32>
    %3 = vector.shape_cast %2 : vector<1x1x8x8xf32> to vector<8x8xf32>
    %cst = arith.constant dense<0.000000e+00> : vector<8x8xf32>
    %4 = tpu.matmul %1, %3, %cst {dimension_numbers = #tpu.dot_dimension_numbers<[1], [1], [0], [0], [0, 0, 1, 0], [], []>} : vector<8x8xf32>, vector<8x8xf32>, vector<8x8xf32> -> vector<8x8xf32>
    %cst_7 = arith.constant dense<0xFF800000> : vector<8xf32>
    %5 = vector.multi_reduction <maximumf>, %4, %cst_7 [1] : vector<8x8xf32> to vector<8xf32>
    %6 = vector.shape_cast %5 : vector<8xf32> to vector<8x1xf32>
    %7 = vector.broadcast %6 : vector<8x1xf32> to vector<8x8xf32>
    %8 = arith.subf %4, %7 : vector<8x8xf32>
    %9 = math.exp %8 : vector<8x8xf32>
    %cst_8 = arith.constant dense<0.000000e+00> : vector<8xf32>
    %10 = vector.multi_reduction <add>, %9, %cst_8 [1] : vector<8x8xf32> to vector<8xf32>
    %11 = vector.shape_cast %10 : vector<8xf32> to vector<8x1xf32>
    %cst_9 = arith.constant 1.000000e+00 : f32
    %12 = vector.broadcast %cst_9 : f32 to vector<8x1xf32>
    %13 = arith.divf %12, %11 : vector<8x1xf32>
    %14 = vector.broadcast %13 : vector<8x1xf32> to vector<8x8xf32>
    %15 = arith.mulf %9, %14 : vector<8x8xf32>
    %c0_10 = arith.constant 0 : index
    %c0_11 = arith.constant 0 : index
    %c0_12 = arith.constant 0 : index
    %c0_13 = arith.constant 0 : index
    %16 = vector.load %arg8[%c0_10, %c0_11, %c0_12, %c0_13] : memref<1x1x8x8xf32, #tpu.memory_space<vmem>>, vector<1x1x8x8xf32>
    %17 = vector.shape_cast %16 : vector<1x1x8x8xf32> to vector<8x8xf32>
    %18 = vector.shape_cast %15 : vector<8x8xf32> to vector<1x1x8x8xf32>
    tpu.vector_store %arg8[%c0_10, %c0_11, %c0_12, %c0_13], %18 {strides = array<i32>} : memref<1x1x8x8xf32, #tpu.memory_space<vmem>>, vector<1x1x8x8xf32>,
    %c0_14 = arith.constant 0 : index
    %c0_15 = arith.constant 0 : index
    %c0_16 = arith.constant 0 : index
    %c0_17 = arith.constant 0 : index
    %19 = vector.load %arg5[%c0_14, %c0_15, %c0_16, %c0_17] : memref<1x1x8x32xf32, #tpu.memory_space<vmem>>, vector<1x1x8x32xf32>
    %20 = vector.shape_cast %19 : vector<1x1x8x32xf32> to vector<8x32xf32>
    %cst_18 = arith.constant dense<0.000000e+00> : vector<8x32xf32>
    %21 = tpu.matmul %15, %20, %cst_18 {dimension_numbers = #tpu.dot_dimension_numbers<[1], [0], [0], [1], [0, 0, 1, 1], [], []>} : vector<8x8xf32>, vector<8x32xf32>, vector<8x32xf32> -> vector<8x32xf32>
    %c0_i32 = arith.constant 0 : i32
    %22 = arith.cmpi eq, %arg2, %c0_i32 : i32
    %23 = arith.extui %22 : i1 to i32
    %c0_i32_19 = arith.constant 0 : i32
    %24 = arith.cmpi ne, %23, %c0_i32_19 : i32
    scf.if %24 {
      %c0_22 = arith.constant 0 : index
      %c0_23 = arith.constant 0 : index
      %28 = vector.load %arg6[%c0_22, %c0_23] : memref<1x32xf32, #tpu.memory_space<vmem>>, vector<1x32xf32>
      %29 = vector.broadcast %28 : vector<1x32xf32> to vector<8x32xf32>
      %30 = arith.addf %21, %29 : vector<8x32xf32>
      %c0_24 = arith.constant 0 : index
      %c0_25 = arith.constant 0 : index
      %c0_26 = arith.constant 0 : index
      %31 = vector.load %arg7[%c0_24, %c0_25, %c0_26] : memref<1x8x32xf32, #tpu.memory_space<vmem>>, vector<1x8x32xf32>
      %32 = vector.shape_cast %31 : vector<1x8x32xf32> to vector<8x32xf32>
      %33 = vector.shape_cast %30 : vector<8x32xf32> to vector<1x8x32xf32>
      tpu.vector_store %arg7[%c0_24, %c0_25, %c0_26], %33 {strides = array<i32>} : memref<1x8x32xf32, #tpu.memory_space<vmem>>, vector<1x8x32xf32>,
    } else {
    }
    %c0_i32_20 = arith.constant 0 : i32
    %25 = arith.cmpi ne, %arg2, %c0_i32_20 : i32
    %26 = arith.extui %25 : i1 to i32
    %c0_i32_21 = arith.constant 0 : i32
    %27 = arith.cmpi ne, %26, %c0_i32_21 : i32
    scf.if %27 {
      %c0_22 = arith.constant 0 : index
      %c0_23 = arith.constant 0 : index
      %c0_24 = arith.constant 0 : index
      %28 = vector.load %arg7[%c0_22, %c0_23, %c0_24] : memref<1x8x32xf32, #tpu.memory_space<vmem>>, vector<1x8x32xf32>
      %29 = vector.shape_cast %28 : vector<1x8x32xf32> to vector<8x32xf32>
      %30 = arith.addf %29, %21 : vector<8x32xf32>
      %c0_25 = arith.constant 0 : index
      %c0_26 = arith.constant 0 : index
      %c0_27 = arith.constant 0 : index
      %31 = vector.load %arg7[%c0_25, %c0_26, %c0_27] : memref<1x8x32xf32, #tpu.memory_space<vmem>>, vector<1x8x32xf32>
      %32 = vector.shape_cast %31 : vector<1x8x32xf32> to vector<8x32xf32>
      %33 = vector.shape_cast %30 : vector<8x32xf32> to vector<1x8x32xf32>
      tpu.vector_store %arg7[%c0_25, %c0_26, %c0_27], %33 {strides = array<i32>} : memref<1x8x32xf32, #tpu.memory_space<vmem>>, vector<1x8x32xf32>,
    } else {
    }
    return
  }
  func.func @transform_0(%arg0: i32, %arg1: i32, %arg2: i32) -> (i32, i32, i32, i32) {
    %c0_i32 = arith.constant 0 : i32
    %c0_i32_0 = arith.constant 0 : i32
    return %arg0, %arg2, %arg1, %c0_i32 : i32, i32, i32, i32
  }
  func.func @transform_1(%arg0: i32, %arg1: i32, %arg2: i32) -> (i32, i32, i32, i32) {
    %c0_i32 = arith.constant 0 : i32
    %c0_i32_0 = arith.constant 0 : i32
    %c0_i32_1 = arith.constant 0 : i32
    return %arg0, %arg2, %c0_i32, %c0_i32_0 : i32, i32, i32, i32
  }
  func.func @transform_2(%arg0: i32, %arg1: i32, %arg2: i32) -> (i32, i32, i32, i32) {
    %c0_i32 = arith.constant 0 : i32
    %c0_i32_0 = arith.constant 0 : i32
    %c0_i32_1 = arith.constant 0 : i32
    return %arg0, %arg2, %c0_i32, %c0_i32_0 : i32, i32, i32, i32
  }
  func.func @transform_3(%arg0: i32, %arg1: i32, %arg2: i32) -> (i32, i32) {
    %c0_i32 = arith.constant 0 : i32
    %c0_i32_0 = arith.constant 0 : i32
    %c0_i32_1 = arith.constant 0 : i32
    return %c0_i32, %c0_i32_0 : i32, i32
  }
  func.func @transform_4(%arg0: i32, %arg1: i32, %arg2: i32) -> (i32, i32, i32) {
    %c0_i32 = arith.constant 0 : i32
    %c0_i32_0 = arith.constant 0 : i32
    return %arg0, %arg1, %c0_i32 : i32, i32, i32
  }
  func.func @transform_5(%arg0: i32, %arg1: i32, %arg2: i32) -> (i32, i32, i32, i32) {
    %c0_i32 = arith.constant 0 : i32
    %c0_i32_0 = arith.constant 0 : i32
    return %arg0, %arg2, %arg1, %c0_i32 : i32, i32, i32, i32
  }
}

</mosaic_0001>

<bundles_post_ra>
// kernel: tpu_custom_call.1
= control target key start
LH: loop header
LB: loop body
LE: loop exit
PB: predicated region body
PF: predicated region fallthrough
CT: control target
= control target key end

     0   :  { %s1592_s0 = inlined_call_operand.hbm [shape: f32[2,4,8,8], index: 0, kind: input, shape index: {}]   ;;  %s1593_s1 = inlined_call_operand.hbm [shape: f32[2,4,8,8], index: 1, kind: input, shape index: {}]   ;;  %s1594_s2 = inlined_call_operand.hbm [shape: f32[2,4,8,32], index: 2, kind: input, shape index: {}]   ;;  %s1595_s3 = inlined_call_operand.vmem [shape: f32[1,32], index: 3, kind: input, shape index: {}]   ;;  %s1596_s4 = inlined_call_operand.hbm [shape: f32[2,8,32], index: 4, kind: output, shape index: {0}]   ;;  %s1597_s5 = inlined_call_operand.hbm [shape: f32[2,4,8,8], index: 5, kind: output, shape index: {1}]  }
   0x1   :  { %1617 = sst [smem:[#allocation28_spill]] %s1593_s1 }
   0x2   :  { %1618 = sst [smem:[#allocation29_spill]] %s1597_s5 }
   0x3   :  { %11 = vsyncpa [#allocation3], 0 }
   0x4   :  { %13 = vsyncpa [#allocation3 + $0x1], 0 }
   0x5   :  { %14 = vsyncpa [#allocation6], 0 }
   0x6   :  { %16 = vsyncpa [#allocation6 + $0x1], 0 }
   0x7   :  { %17 = vsyncpa [#allocation4], 0 }
   0x8   :  { %19 = vsyncpa [#allocation4 + $0x1], 0 }
   0x9   :  { %20 = vsyncpa [#allocation10], 0 }
   0xa   :  { %22 = vsyncpa [#allocation10 + $0x1], 0  ;;  %s1212_s18 = smov 0   ;;  %s1214_s19 = smov 0  }
   0xb   :  { %s1216_s20 = smov 0   ;;  %s1218_s21 = smov 0  }
   0xc   :  { %s1220_s22 = smov 0   ;;  %s1222_s23 = smov 0  }
   0xd   :  { %s1224_s24 = smov 0   ;;  %s1226_s25 = smov 0  }
   0xe   :  { %s1228_s26 = smov 0   ;;  %s1230_s27 = smov 0  }
   0xf   :  { %s1232_s28 = smov 0  }
  0x10 LB: > { %1619 = sst [smem:[#allocation15_spill]] %s1133_s18  ;;  %s1268_s29 = sadd.s32 4294967295, %s1173_s28   ;;  %s1173_s28 = sphi %s1232_s28, %s28_s28   ;;  %s1169_s27 = sphi %s1230_s27, %s1665_s27   ;;  %s1165_s26 = sphi %s1228_s26, %s1664_s26   ;;  %s1161_s25 = sphi %s1226_s25, %s1663_s25   ;;  %s1157_s24 = sphi %s1224_s24, %s1662_s24   ;;  %s1153_s23 = sphi %s1222_s23, %s1670_s23   ;;  %s1149_s22 = sphi %s1220_s22, %s1669_s22   ;;  %s1145_s21 = sphi %s1218_s21, %s1668_s21   ;;  %s1141_s20 = sphi %s1216_s20, %s1660_s20   ;;  %s1137_s19 = sphi %s1214_s19, %s1667_s19   ;;  %s1133_s18 = sphi %s1212_s18, %s1666_s18  }
  0x11   : > { %1620 = sst [smem:[#allocation16_spill]] %s1141_s20  ;;  %s757_s30 = sadd.s32 4294967294, %s1173_s28  }
  0x12   : > { %1621 = sst [smem:[#allocation17_spill]] %s1145_s21  ;;  %s40_s6 = sadd.s32 1, %s1165_s26 }
  0x13   : > { %1622 = sst [smem:[#allocation18_spill]] %s1165_s26  ;;  %s47_s7 = sadd.s32 1, %s1169_s27 }
  0x14   : > { %1623 = sst [smem:[#allocation19_spill]] %s1169_s27  ;;  %p41_p0 = scmp.ge.s32.totalorder %s40_s6, 4 }
  0x15   : > { %1624 = sst [smem:[#allocation20_spill]] %s1173_s28  ;;  %s58_s8 = sadd.s32 1, %s1153_s23 }
  0x16   : > { %p65_p1 = scmp.ne.s32.totalorder %s1153_s23, %s1149_s22  ;;  %p66_p2 = scmp.eq.s32.totalorder %s1173_s28, 0 }
  0x17   : > { %s1672_s6 = smov (%p41_p0, %s40_s6), 0  ;;  %s1674_s7 = smov (!%p41_p0, %s47_s7), %s1169_s27 }
  0x18   : > { %1625 = sst [smem:[#allocation21_spill]] %s1672_s6  ;;  %s52_s9 = ssub.s32 %s1165_s26, %s1672_s6 }
  0x19   : > { %p1285_p3 = por %p66_p2, %p65_p1  ;;  %p49_p4 = scmp.ge.s32.totalorder %s1674_s7, 2 }
  0x1a   : > { %p71_p5 = scmp.ne.s32.totalorder %s1149_s22, %s1145_s21  ;;  %p72_p6 = scmp.eq.s32.totalorder %s1268_s29, 0 }
  0x1b   : > { %s163_s11 = sadd.s32 1, %s1141_s20  ;;  %s1676_s7 = smov (%p49_p4, %s1674_s7), 0 }
  0x1c   : > { %1627 = sst [smem:[#allocation22_spill]] %s1676_s7  ;;  %p1298_p7 = por %p72_p6, %p71_p5 }
  0x1d   : > { %p173_p8 = scmp.ne.s32.totalorder %s1141_s20, %s1137_s19  ;;  %s51_s13 = ssub.s32 %s1169_s27, %s1676_s7 }
  0x1e   : > { %s1628_s12 = scalar_select %p1298_p7, 1, 0 }
  0x1f   : > { %p174_p9 = scmp.eq.s32.totalorder %s1268_s29, 7  ;;  %s53_s14 = sor.u32 %s52_s9, %s51_s13 }
  0x20   : > { %p161_p10 = scmp.eq.s32.totalorder %s51_s13, 0  ;;  %p56_p11 = scmp.eq.s32.totalorder %s53_s14, 0 }
  0x21   : > { %p1307_p12 = por %p174_p9, %p173_p8  ;;  %p179_p13 = scmp.ne.s32.totalorder %s1137_s19, %s1133_s18 }
  0x22   : > { %s1312_s16 = scalar_select %p161_p10, %s1141_s20, %s163_s11  }
  0x23   : > { %s1629_s15 = scalar_select %p1307_p12, 1, 0 }
  0x24   : > { %1630 = sst [smem:[#allocation23_spill]] %s1312_s16  ;;  %p180_p0 = scmp.eq.s32.totalorder %s757_s30, 7 }
  0x25   : > { %s1315_s17 = scalar_select %p56_p11, %s1153_s23, %s58_s8  }
  0x26   : > { %p1322_p2 = por %p174_p9, %p65_p1  ;;  %p1326_p4 = por %p180_p0, %p179_p13 }
  0x27   : > { %1631 = sst [smem:[#allocation24_spill]] %s1315_s17  ;;  %p1333_p6 = por %p180_p0, %p71_p5 }
  0x28   : > { %s1632_s7 = scalar_select %p1322_p2, 1, 0 }
  0x29   : > { %s1634_s9 = scalar_select %p1326_p4, 1, 0 }
  0x2a   : > { %1633 = sst [smem:[#allocation25_spill]] %s1632_s7  ;;  %p829_p8 = scmp.lt.s32.totalorder %s1173_s28, 8 }
  0x2b   : > { %1635 = sst [smem:[#allocation26_spill]] %s1634_s9  ;;  %s1603_s8 = sand.u32 1, %s1153_s23  }
  0x2c   : > { %s1636_s13 = scalar_select %p1333_p6, 1, 0 }
  0x2d   : > { %s1341_s11 = sshll.u32 %s1603_s8, 3  ;;  %s761_s30 = sshll.u32 %s1169_s27, 2 }
  0x2e   : > { %1637 = sst [smem:[#allocation27_spill]] %s1636_s13  ;;  %s243_s14 = sadd.s32 %s1165_s26, %s761_s30 }
  0x2f   : > { %p1347_p1 = pnand %p829_p8, %p1285_p3  ;;  %s1351_s17 = sshll.u32 %s243_s14, 7 }
  0x30   : > { %s254_s16 = sand.u32 1, %s1173_s28   ;;  %s1639_s1 = sld [smem:[#allocation28_spill]] }
  0x31   : > { %s1638_s6 = scalar_select %p1347_p1, 1, 0 }
  0x32   : > { %s258_s30 = scalar_lea.vmem [#allocation5], %s1341_s11  ;;  %s1365_s8 = scalar_lea.sflag [#allocation6], %s254_s16 }
  0x33   : > { %s267_s10 = sshll.u32 %s258_s30, 4  ;;  %p1371_p10 = pneg %p1347_p1  ;;  %s1362_s10 = int_to_ptr.vmem [resolvable:$true] %s267_s10 }
  0x36   : > { %s1358_s21 = scalar_lea.hbm %s1639_s1, %s1351_s17  ;;  %s930_s30 = scalar_lea.hbm %s1639_s1, 1024 }
  0x37   : > { %s925_s14 = scalar_lea.hbm %s1358_s21, 128  ;;  %p931_p0 = scmp.lt.u32.totalorder %s1358_s21, %s1639_s1 }
  0x38   : > { %p926_p9 = scmp.ne.s32.totalorder %s1358_s21, %s925_s14  ;;  %p932_p8 = scmp.lt.u32.totalorder %s930_s30, %s925_s14 }
  0x39   : > { %p934_p5 = scmp.lt.u32.totalorder %s925_s14, %s1358_s21 }
  0x3a   : > { %p928_p11 = pnand %p1371_p10, %p926_p9  ;;  %p933_p3 = por %p932_p8, %p931_p0 }
  0x3c   : > { %p929_p13 = pneg %p928_p11  ;;  %p935_p6 = por %p934_p5, %p933_p3 }
  0x3e   : > { %p936_p4 = pnand %p935_p6, %p929_p13 }
  0x40   : > { %939 = shalt.err (!%p936_p4)
}
  0x41   : > { %s940_s16 = scalar_lea.vmem %s1362_s10, 128  ;;  %s1175_s20 = smov [#allocation5]  }
  0x42   : > { %p941_p9 = scmp.ne.s32.totalorder %s1362_s10, %s940_s16  ;;  %s945_s13 = sshll.u32 %s1175_s20, 4  ;;  %s946_s13 = int_to_ptr.vmem [resolvable:$false] %s945_s13 }
  0x43   : > { %s947_s26 = scalar_lea.vmem %s946_s13, 256  ;;  %p948_p12 = scmp.lt.s32.totalorder %s1362_s10, %s946_s13 }
  0x44   : > { %p943_p11 = pnand %p941_p9, %p1371_p10  ;;  %p949_p7 = scmp.lt.s32.totalorder %s947_s26, %s940_s16 }
  0x46   : > { %p944_p2 = pneg %p943_p11  ;;  %p950_p0 = por %p949_p7, %p948_p12 }
  0x48   : > { %p951_p8 = pnand %p950_p0, %p944_p2 }
  0x4a   : > { %954 = shalt.err (!%p951_p8)
}
  0x4b   : > { %818 = dma.hbm_to_vmem [thread:$0]  (!%p1347_p1), %s1358_s21, 128, %s1362_s10, %s1365_s8  }
  0x4c   : > { %p1641_p4 = scmp.lt.s32.totalorder %s1173_s28, 9  ;;  %p1642_p6 = scmp.ge.s32.totalorder %s1173_s28, 1 }
  0x4d   : > { %s1407_s16 = scalar_lea.hbm %s1592_s0, %s1351_s17  ;;  %s237_s20 = scalar_lea.vmem [#allocation2], %s1341_s11 }
  0x4e   : > { %p1399_p3 = pnand %p1642_p6, %p1641_p4  ;;  %s247_s13 = sshll.u32 %s237_s20, 4  ;;  %s1410_s13 = int_to_ptr.vmem [resolvable:$true] %s247_s13 }
  0x4f   : > { %s1416_s26 = scalar_lea.hbm %s1594_s2, %s1351_s17  ;;  %s1644_s1 = sand.u32 1, %s1153_s23  }
  0x50   : > { %s1643_s9 = scalar_select %p1399_p3, 1, 0 }
  0x51   : > { %s234_s18 = scalar_lea.sflag [#allocation3], %s1644_s1  ;;  %s955_s28 = scalar_lea.hbm %s1407_s16, 128 }
  0x52   : > { %p956_p7 = scmp.ne.s32.totalorder %s1407_s16, %s955_s28  ;;  %s960_s5 = scalar_lea.hbm %s1592_s0, 1024 }
  0x53   : > { %p961_p5 = scmp.lt.u32.totalorder %s1407_s16, %s1592_s0  ;;  %p962_p13 = scmp.lt.u32.totalorder %s960_s5, %s955_s28 }
  0x54   : > { %p958_p12 = pnand %p956_p7, %p1371_p10  ;;  %p964_p11 = scmp.lt.u32.totalorder %s955_s28, %s1407_s16 }
  0x55   : > { %p963_p9 = por %p962_p13, %p961_p5 }
  0x56   : > { %p959_p2 = pneg %p958_p12 }
  0x57   : > { %p965_p0 = por %p964_p11, %p963_p9 }
  0x59   : > { %p966_p8 = pnand %p965_p0, %p959_p2 }
  0x5b   : > { %969 = shalt.err (!%p966_p8)
}
  0x5c   : > { %s970_s1 = scalar_lea.vmem %s1410_s13, 128  ;;  %s1176_s17 = smov [#allocation2]  }
  0x5d   : > { %p971_p4 = scmp.ne.s32.totalorder %s1410_s13, %s970_s1  ;;  %s975_s21 = sshll.u32 %s1176_s17, 4  ;;  %s976_s21 = int_to_ptr.vmem [resolvable:$false] %s975_s21 }
  0x5e   : > { %s977_s7 = scalar_lea.vmem %s976_s21, 256  ;;  %p978_p12 = scmp.lt.s32.totalorder %s1410_s13, %s976_s21 }
  0x5f   : > { %p973_p6 = pnand %p971_p4, %p1371_p10  ;;  %p979_p3 = scmp.lt.s32.totalorder %s977_s7, %s970_s1 }
  0x61   : > { %p974_p7 = pneg %p973_p6  ;;  %p980_p5 = por %p979_p3, %p978_p12 }
  0x63   : > { %p981_p13 = pnand %p980_p5, %p974_p7 }
  0x65   : > { %984 = shalt.err (!%p981_p13)
}
  0x66   : > { %815 = dma.hbm_to_vmem [thread:$0]  (!%p1347_p1), %s1407_s16, 128, %s1410_s13, %s234_s18  }
  0x67   : > { %s278_s5 = scalar_lea.vmem [#allocation7], %s1341_s11  ;;  %s985_s10 = scalar_lea.hbm %s1416_s26, 128 }
  0x68   : > { %s287_s28 = sshll.u32 %s278_s5, 4  ;;  %p986_p2 = scmp.ne.s32.totalorder %s1416_s26, %s985_s10  ;;  %s288_s28 = int_to_ptr.vmem [resolvable:$true] %s287_s28 }
  0x69   : > { %s990_s20 = scalar_lea.hbm %s1594_s2, 1024  ;;  %p991_p11 = scmp.lt.u32.totalorder %s1416_s26, %s1594_s2 }
  0x6a   : > { %p988_p3 = pnand %p986_p2, %p1371_p10  ;;  %p992_p0 = scmp.lt.u32.totalorder %s990_s20, %s985_s10 }
  0x6b   : > { %p994_p4 = scmp.lt.u32.totalorder %s985_s10, %s1416_s26 }
  0x6c   : > { %p989_p9 = pneg %p988_p3  ;;  %p993_p8 = por %p992_p0, %p991_p11 }
  0x6e   : > { %p995_p6 = por %p994_p4, %p993_p8 }
  0x70   : > { %p996_p7 = pnand %p995_p6, %p989_p9 }
  0x72   : > { %999 = shalt.err (!%p996_p7)
}
  0x73   : > { %s1000_s18 = scalar_lea.vmem %s288_s28, 128  ;;  %s1177_s11 = smov [#allocation7]  }
  0x74   : > { %p1001_p12 = scmp.ne.s32.totalorder %s288_s28, %s1000_s18  ;;  %s1005_s16 = sshll.u32 %s1177_s11, 4  ;;  %s1006_s16 = int_to_ptr.vmem [resolvable:$false] %s1005_s16 }
  0x75   : > { %s1007_s13 = scalar_lea.vmem %s1006_s16, 256  ;;  %p1008_p2 = scmp.lt.s32.totalorder %s288_s28, %s1006_s16 }
  0x76   : > { %p1003_p5 = pnand %p1001_p12, %p1371_p10  ;;  %p1009_p3 = scmp.lt.s32.totalorder %s1007_s13, %s1000_s18 }
  0x78   : > { %p1004_p13 = pneg %p1003_p5  ;;  %p1010_p1 = por %p1009_p3, %p1008_p2 }
  0x7a   : > { %p1011_p0 = pnand %p1010_p1, %p1004_p13 }
  0x7c   : > { %1014 = shalt.err (!%p1011_p0)
}
  0x7d   : > { %p1645_p11 = scmp.ne.s32.totalorder %s1638_s6, 0  ;;  %p1646_p9 = scmp.ne.s32.totalorder %s1643_s9, 0 }
  0x7e   : > { %s1463_s27 = sand.u32 (!%p1646_p9), 1, %s1149_s22   ;;  %p1647_p1 = scmp.ne.s32.totalorder (!%p1646_p9), %s1628_s12, 0 }
  0x7f   : > { %821 = dma.hbm_to_vmem [thread:$0]  (!%p1645_p11), %s1416_s26, 128, %s288_s28, %s1365_s8  }
  0x80   : > { %296 = sbr.rel (%p1646_p9) target bundleno = 947 (0x3b3), region = 36  ;;  %s1466_s21 = sshll.u32 (!%p1646_p9), %s1463_s27, 3 }
  0x81   : > { %s299_s7 = scalar_lea.sflag (!%p1646_p9), [#allocation3], %s1463_s27  ;;  %s302_s5 = scalar_lea.vmem (!%p1646_p9), [#allocation2], %s1466_s21 }
  0x87   : > { %1116 = dma.done.wait (%p1647_p1), %s299_s7, 128  }
  0x88   : > { %1118 = vsyncadd (%p1647_p1), %s299_s7, 4294967168  ;;  %s307_s6 = sand.u32 1, %s1268_s29   ;;  %s311_s9 = scalar_lea.vmem [#allocation5], %s1466_s21 }
  0x89   : > { %s308_s8 = scalar_lea.sflag [#allocation6], %s307_s6 }
  0x8a   : > { %1120 = dma.done.wait (%p1647_p1), %s308_s8, 256  }
  0x8b   : > { %1122 = vsyncadd (%p1647_p1), %s308_s8, 4294967040  ;;  %s352_s26 = sand.u32 1, %s1137_s19   ;;  %v1178_v0 = vmov 0.0   ;;  %vm1179_vm0 = vmmov 0   ;;  %vm364_vm1 = vcmask 64512   ;;  %v363_v1 = vld [vmem:[%s311_s9] sm:$0xff] }
  0x8c   : > { %s1483_s28 = sshll.u32 %s352_s26, 3  ;;  %792 = vmatprep.subr.mxu0 %v1178_v0  ;;  %794 = vmatprep.mubr.msk.f32.mxu0 %vm1179_vm0, %v1178_v0  ;;  %v362_v2 = vld [vmem:[%s302_s5] sm:$0xff]  ;;  %s320_s29 = scalar_lea.vmem [#allocation7], %s1466_s21 }
  0x8d   : > { %797 = vmatprep.subr.mxu1 %v1178_v0  ;;  %799 = vmatprep.mubr.msk.f32.mxu1 %vm1179_vm0, %v1178_v0  ;;  %v454_v11 = vld [vmem:[%s320_s29] sm:$0xff]  ;;  %s361_s12 = scalar_lea.vmem [#allocation9], %s1466_s21  ;;  %s354_s10 = scalar_lea.vmem [#allocation8], %s1483_s28 }
  0x8e   : > { %793 = vmatpush3.xpose.msk.msra.mxu0 %vm364_vm1, %v363_v1  ;;  %798 = vmatpush3.msra.mxu1 %v454_v11  ;;  %p778_p10 = scmp.ne.s32.totalorder %s1157_s24, 0 }
  0x8f   : > { %v779_v17 = vld [vmem:[%s1595_s3] ss:$0 sm:$0xff] (!%p778_p10)  ;;  %vm540_vm2 = vcmask (!%p778_p10), 261120  }
  0x91   : > { %795 = vmatmul.mubr.msk.f32.vlgmr.msra.gmra.mrb[0].mxu0 %vm364_vm1, %v362_v2 }
 0x164   : > { %v437_v3 = vpop.f32.mrb[0].mxu0 }
 0x165   : > { %v796_v4 = vpop.f32.mrb[1].mxu0  ;;  %v441_v5 = vsel %vm364_vm1, %v437_v3, -inf }
 0x166   : > { %442 = vmax.xlane.f32.xlu0 %v441_v5 }
 0x1f3   : > { %v443_v6 = vpop.xlane.xlu0 %442 }
 0x1f4   : > { %v444_v7 = vsub.f32 %v437_v3, %v443_v6 }
 0x1f6   : > { %v445_v8 = vmul.f32 1.442695, %v444_v7 }
 0x1f8   : > { %921 = vpow2.f32 %v445_v8 }
 0x202   : > { %v922_v9 = vpop.eup %921 }
 0x203   : > { %v447_v10 = vsel %vm364_vm1, %v922_v9, 0.0 }
 0x204   : > { %448 = vadd.xlane.f32.xlu0 %v447_v10 }
 0x291   : > { %v449_v12 = vpop.xlane.xlu0 %448 }
 0x292   : > { %923 = vrcp.f32 %v449_v12 }
 0x29c   : > { %v924_v13 = vpop.eup %923 }
 0x29d   : > { %v452_v14 = vmul.f32 %v924_v13, %v922_v9 }
 0x29f   : > { %453 = vst.msk [vmem:[%s361_s12] sm:$0xff] %vm364_vm1, %v452_v14  ;;  %800 = vmatmul.mubr.msk.f32.vlgmr.msra.gmra.mrb[0].mxu1 %vm364_vm1, %v452_v14 }
 0x36d   : > { %531 = sbr.rel (%p778_p10) target bundleno = 886 (0x376), region = 52 }
 0x372   : > { %v524_v15 = vpop.f32.mrb[0].mxu1 }
 0x373   : > { %v801_v16 = vpop.f32.mrb[1].mxu1  ;;  %v539_v18 = vadd.f32 (!%p778_p10), %v779_v17, %v524_v15 }
 0x375   : > { %541 = vst.msk [vmem:[%s354_s10] sm:$0xff] %vm540_vm2, %v539_v18 }
 0x376 PF: > { %p780_p8 = scmp.eq.s32.totalorder %s1157_s24, 0 }
 0x377   : > { %vm548_vm3 = vcmask (!%p780_p8), 261120  }
 0x378   : > { %545 = sbr.rel (%p780_p8) target bundleno = 896 (0x380), region = 56 }
 0x37c   : > { %v546_v19 = vld [vmem:[%s354_s10] sm:$0xff] (!%p780_p8) }
 0x37d   : > { %v547_v20 = vadd.f32 (!%p780_p8), %v546_v19, %v524_v15 }
 0x37f   : > { %549 = vst.msk [vmem:[%s354_s10] sm:$0xff] %vm548_vm3, %v547_v20 }
 0x380 PF: > { %s783_s20 = sshll.u32 %s1161_s25, 7  ;;  %s570_s11 = sshll.u32 %s354_s10, 4  ;;  %s571_s11 = int_to_ptr.vmem [resolvable:$true] %s570_s11 }
 0x381   : > { %s1505_s18 = scalar_lea.hbm %s1596_s4, %s783_s20  ;;  %s551_s16 = scalar_lea.sflag [#allocation4], %s352_s26 }
 0x382   : > { %s1015_s13 = scalar_lea.vmem %s571_s11, 128  ;;  %p1648_p6 = scmp.ne.s32.totalorder %s1629_s15, 0 }
 0x383   : > { %p1016_p4 = scmp.ne.s32.totalorder %s571_s11, %s1015_s13  ;;  %s1180_s7 = smov [#allocation8]  }
 0x384   : > { %s1019_s5 = sshll.u32 %s1180_s7, 4  ;;  %s1020_s5 = int_to_ptr.vmem [resolvable:$false] %s1019_s5 }
 0x385   : > { %p1017_p7 = pnand %p1016_p4, %p1648_p6  ;;  %s1021_s6 = scalar_lea.vmem %s1020_s5, 256 }
 0x386   : > { %p1022_p5 = scmp.lt.s32.totalorder %s571_s11, %s1020_s5  ;;  %p1023_p13 = scmp.lt.s32.totalorder %s1021_s6, %s1015_s13 }
 0x387   : > { %p1018_p12 = pneg %p1017_p7 }
 0x388   : > { %p1024_p2 = por %p1023_p13, %p1022_p5 }
 0x38a   : > { %p1025_p3 = pnand %p1024_p2, %p1018_p12 }
 0x38c   : > { %1028 = shalt.err (!%p1025_p3)
}
 0x38d   : > { %s1029_s8 = scalar_lea.hbm %s1505_s18, 128  ;;  %s1033_s28 = scalar_lea.hbm %s1596_s4, 256 }
 0x38e   : > { %p1030_p0 = scmp.ne.s32.totalorder %s1505_s18, %s1029_s8  ;;  %p1034_p1 = scmp.lt.u32.totalorder %s1505_s18, %s1596_s4 }
 0x38f   : > { %p1035_p10 = scmp.lt.u32.totalorder %s1033_s28, %s1029_s8  ;;  %p1037_p4 = scmp.lt.u32.totalorder %s1029_s8, %s1505_s18 }
 0x390   : > { %p1031_p11 = pnand %p1030_p0, %p1648_p6 }
 0x391   : > { %p1036_p8 = por %p1035_p10, %p1034_p1 }
 0x392   : > { %p1032_p9 = pneg %p1031_p11 }
 0x393   : > { %p1038_p7 = por %p1037_p4, %p1036_p8 }
 0x395   : > { %p1039_p12 = pnand %p1038_p7, %p1032_p9 }
 0x397   : > { %1042 = shalt.err (!%p1039_p12)
}
 0x398   : > { %s1649_s14 = sld [smem:[#allocation25_spill]]  ;;  %s784_s30 = sshll.u32 %s1161_s25, 2 }
 0x399   : > { %808 = dma.vmem_to_hbm [thread:$0]  (%p1648_p6), %s571_s11, 128, %s1505_s18, %s551_s16  }
 0x39a   : > { %s586_s20 = sshll.u32 %s361_s12, 4  ;;  %s582_s1 = sadd.s32 %s1157_s24, %s784_s30  ;;  %s1530_s20 = int_to_ptr.vmem [resolvable:$true] %s586_s20 }
 0x39b   : > { %s785_s17 = sshll.u32 %s582_s1, 7  ;;  %s1650_s15 = sld [smem:[#allocation29_spill]] }
 0x39c   : > { %s556_s6 = scalar_lea.sflag [#allocation10], %s1463_s27  ;;  %s1043_s8 = scalar_lea.vmem %s1530_s20, 128 }
 0x39d   : > { %p1044_p5 = scmp.ne.s32.totalorder %s1530_s20, %s1043_s8  ;;  %s1181_s25 = smov [#allocation9]  }
 0x39e   : > { %p1651_p13 = scmp.ne.s32.totalorder %s1649_s14, 0  ;;  %s1047_s21 = sshll.u32 %s1181_s25, 4  ;;  %s1048_s21 = int_to_ptr.vmem [resolvable:$false] %s1047_s21 }
 0x39f   : > { %s1049_s24 = scalar_lea.vmem %s1048_s21, 256  ;;  %p1050_p3 = scmp.lt.s32.totalorder %s1530_s20, %s1048_s21 }
 0x3a0   : > { %p1045_p2 = pnand %p1044_p5, %p1651_p13  ;;  %p1051_p0 = scmp.lt.s32.totalorder %s1049_s24, %s1043_s8 }
 0x3a1   : > { %s584_s5 = scalar_lea.hbm %s1650_s15, %s785_s17 }
 0x3a2   : > { %p1046_p6 = pneg %p1045_p2  ;;  %p1052_p11 = por %p1051_p0, %p1050_p3 }
 0x3a4   : > { %p1053_p9 = pnand %p1052_p11, %p1046_p6 }
 0x3a6   : > { %1056 = shalt.err (!%p1053_p9)
}
 0x3a7   : > { %s1057_s12 = scalar_lea.hbm %s584_s5, 128  ;;  %s1061_s11 = scalar_lea.hbm %s1650_s15, 1024 }
 0x3a8   : > { %p1058_p1 = scmp.ne.s32.totalorder %s584_s5, %s1057_s12  ;;  %p1062_p4 = scmp.lt.u32.totalorder %s584_s5, %s1650_s15 }
 0x3a9   : > { %p1063_p7 = scmp.lt.u32.totalorder %s1061_s11, %s1057_s12  ;;  %p1065_p5 = scmp.lt.u32.totalorder %s1057_s12, %s584_s5 }
 0x3aa   : > { %p1059_p10 = pnand %p1058_p1, %p1651_p13 }
 0x3ab   : > { %p1064_p12 = por %p1063_p7, %p1062_p4 }
 0x3ac   : > { %p1060_p8 = pneg %p1059_p10 }
 0x3ad   : > { %p1066_p2 = por %p1065_p5, %p1064_p12 }
 0x3af   : > { %p1067_p6 = pnand %p1066_p2, %p1060_p8 }
 0x3b1   : > { %1070 = shalt.err (!%p1067_p6)
}
 0x3b2   : > { %809 = dma.vmem_to_hbm [thread:$0]  (%p1651_p13), %s1530_s20, 128, %s584_s5, %s556_s6  }
 0x3b3 PF: > { %s1652_s26 = sld [smem:[#allocation20_spill]]  ;;  %s1653_s28 = sld [smem:[#allocation15_spill]] }
 0x3b4   : > { %s1654_s29 = sld [smem:[#allocation26_spill]] }
 0x3b9   : > { %p830_p3 = scmp.ge.s32.totalorder %s1652_s26, 2  ;;  %s598_s10 = sand.u32 1, %s1653_s28  }
 0x3ba   : > { %p1655_p0 = scmp.ne.s32.totalorder %s1654_s29, 0  ;;  %s599_s30 = scalar_lea.sflag [#allocation4], %s598_s10 }
 0x3bc   : > { %p823_p11 = pnand %p830_p3, %p1655_p0 }
 0x3be   : > { %1124 = dma.done.wait (!%p823_p11), %s599_s30, 128  }
 0x3bf   : > { %1126 = vsyncadd (!%p823_p11), %s599_s30, 4294967168  ;;  %s1656_s1 = sld [smem:[#allocation17_spill]]  ;;  %s1657_s17 = sld [smem:[#allocation27_spill]] }
 0x3c5   : > { %s607_s13 = sand.u32 1, %s1656_s1   ;;  %p1658_p9 = scmp.ne.s32.totalorder %s1657_s17, 0 }
 0x3c6   : > { %s608_s7 = scalar_lea.sflag [#allocation10], %s607_s13 }
 0x3c7   : > { %p826_p1 = pnand %p830_p3, %p1658_p9 }
 0x3c9   : > { %1128 = dma.done.wait (!%p826_p1), %s608_s7, 128  }
 0x3ca   : > { %1130 = vsyncadd (!%p826_p1), %s608_s7, 4294967168  ;;  %s28_s28 = sadd.s32 1, %s1652_s26   ;;  %s1659_s14 = sld [smem:[#allocation16_spill]] }
 0x3cb   : > { %p25_p13 = scmp.ge.s32.totalorder %s28_s28, 10   ;;  %s1660_s20 = sld [smem:[#allocation23_spill]] }
 0x3cc   : > { %s1661_s5 = sld [smem:[#allocation24_spill]]  ;;  %s1662_s24 = sld [smem:[#allocation18_spill]] }
 0x3cd   : > { %s1663_s25 = sld [smem:[#allocation19_spill]]  ;;  %s1664_s26 = sld [smem:[#allocation21_spill]] }
 0x3ce   : > { %s1665_s27 = sld [smem:[#allocation22_spill]]  ;;  %s1666_s18 = smov %s1137_s19 }
 0x3cf   : > { %s1668_s21 = smov %s1149_s22  ;;  %s1669_s22 = smov %s1153_s23 }
 0x3d0   : > { %s1667_s19 = smov %s1659_s14  ;;  %27 = sbr.rel (!%p25_p13) target bundleno = 16 (0x10), region = 130 }
 0x3d2   : > { %s1670_s23 = smov %s1661_s5 }
 0x3d7   :  { %613 = vsyncpa [#allocation3], 1 }
 0x3d8   :  { %615 = vsyncpa [#allocation3 + $0x1], 1 }
 0x3d9   :  { %616 = vsyncpa [#allocation6], 1 }
 0x3da   :  { %618 = vsyncpa [#allocation6 + $0x1], 1 }
 0x3db   :  { %619 = vsyncpa [#allocation4], 1 }
 0x3dc   :  { %621 = vsyncpa [#allocation4 + $0x1], 1 }
 0x3dd   :  { %622 = vsyncpa [#allocation10], 1 }
 0x3de   :  { %624 = vsyncpa [#allocation10 + $0x1], 1 }

</bundles_post_ra>
